<compile_context>
chip_gen: v7x
topology: tpu7x:2x2x1
jax: 0.10.0
libtpu: 0.0.40
codegen_flags: <defaults>
</compile_context>

<pallas_src>
import jax
import jax.numpy as jnp
from jax.experimental import pallas as pl
from jax.experimental.pallas import tpu as pltpu


def _round_up(x, m):
    return ((x + m - 1) // m) * m


def _divisor_tiles_desc(padded_dim):
    """Divisors of padded_dim that are multiples of 128, descending."""
    return [t for t in range(padded_dim, 127, -128) if padded_dim % t == 0]


def _vmem_capacity_bytes():
    """Generation-aware VMEM capacity (64 MiB/TC on v7x, 128 MiB on v5e/v6e)."""
    try:
        info = pltpu.get_tpu_info()
        cap = getattr(info, "vmem_capacity_bytes", None)
        if cap:
            return int(cap)
    except Exception:
        pass
    return 64 * 1024 * 1024  # conservative fallback (v7x per-TensorCore VMEM)


def _select_tiles(B_p, in_p, out_p, w_bytes, out_bytes, vmem_cap):
    """Pick (tn, tk, vmem_limit): the largest weight tiles that fit the
    per-chip VMEM budget (whole-weight residency when possible), keeping >=2
    output tiles so the parallel j axis can shard across v7x's 2 TensorCores."""
    budget = int(vmem_cap * 0.7)                 # headroom for internal scratch
    x_bytes = 2 * 2 * B_p * in_p * w_bytes       # x_mu + x_sig, fully resident

    def usage(tn, tk):
        return (x_bytes
                + 2 * 2 * tn * tk * w_bytes      # mu_W^T + sigma_W^T, double-buffered
                + 2 * 2 * tn * 4                 # bias + eps_q rows
                + 2 * B_p * tn * out_bytes       # output tile
                + 2 * B_p * tn * 4)              # two f32 accumulators

    tk_cands = _divisor_tiles_desc(in_p)
    tn_cands = _divisor_tiles_desc(out_p)
    tk = next((t for t in tk_cands if usage(128, t) <= budget), tk_cands[-1])
    tn = next((t for t in tn_cands if usage(t, tk) <= budget), tn_cands[-1])

    # Megacore: keep >= 2 j-tiles (v7x has 2 TCs; one extra grid step on
    # single-TC v5e/v6e costs ~0.35 us, negligible).
    if out_p // tn < 2 and out_p >= 256:
        tn = next((t for t in tn_cands if t <= out_p // 2), tn)

    est = usage(tn, tk)
    vmem_limit = max(32 * 1024 * 1024, int(est * 1.25) + (1 << 20))
    vmem_limit = min(vmem_limit, int(vmem_cap))
    return tn, tk, vmem_limit


def noisy_linear_kernel(x_mu_ref, x_sig_ref, mu_w_ref, sigma_w_ref, bias_ref,
                        eps_q_ref, o_ref, acc_mu_ref, acc_sig_ref):
    k = pl.program_id(1)
    tk = mu_w_ref.shape[0]                       # static block size (mult. of 128)

    @pl.when(k == 0)
    def _init():
        acc_mu_ref[...] = jnp.zeros_like(acc_mu_ref)
        acc_sig_ref[...] = jnp.zeros_like(acc_sig_ref)

    # x / x*eps_p are fully VMEM-resident; slice the current K-chunk in-kernel.
    off = pl.multiple_of(k * tk, 128)
    x_mu = x_mu_ref[:, pl.ds(off, tk)]           # (B_p, tk), streaming dtype
    x_sig = x_sig_ref[:, pl.ds(off, tk)]         # (B_p, tk), eps_p already folded

    # Weights pre-transposed to (in_p, out_p): plain MXU contraction, f32 acc.
    acc_mu_ref[...] += jnp.dot(x_mu, mu_w_ref[...],
                               preferred_element_type=jnp.float32)
    acc_sig_ref[...] += jnp.dot(x_sig, sigma_w_ref[...],
                                preferred_element_type=jnp.float32)

    @pl.when(k == pl.num_programs(1) - 1)
    def _finalize():
        o_ref[...] = (acc_mu_ref[...]
                      + eps_q_ref[...] * acc_sig_ref[...]
                      + bias_ref[...]).astype(o_ref.dtype)


def prepare_noisy_linear_params(mu_W, sigma_W, mu_bias, sigma_bias,
                                *, weight_dtype=jnp.bfloat16):
    """ONE-TIME prep (do NOT call per forward): pad weights to lane-dense
    128-multiples, transpose to (in_p, out_p), cast to the streaming dtype."""
    out_f, in_f = mu_W.shape
    in_p = _round_up(in_f, 128)
    out_p = _round_up(out_f, 128)
    pad_w = ((0, out_p - out_f), (0, in_p - in_f))
    mu_Wt = jnp.pad(mu_W.astype(jnp.float32), pad_w).T.astype(weight_dtype)
    sigma_Wt = jnp.pad(sigma_W.astype(jnp.float32), pad_w).T.astype(weight_dtype)
    mu_bias_p = jnp.pad(mu_bias.astype(jnp.float32), (0, out_p - out_f))
    sigma_bias_p = jnp.pad(sigma_bias.astype(jnp.float32), (0, out_p - out_f))
    return dict(mu_Wt=mu_Wt, sigma_Wt=sigma_Wt,
                mu_bias=mu_bias_p, sigma_bias=sigma_bias_p,
                in_f=in_f, out_f=out_f, in_p=in_p, out_p=out_p,
                weight_dtype=jnp.dtype(weight_dtype))


def noisy_linear_forward(x, prepared, eps_p, eps_q):
    """x: (B, in_f); prepared: output of prepare_noisy_linear_params.
    Returns (B, out_f) in x.dtype (training-mode NoisyLinear forward)."""
    in_f, out_f = prepared["in_f"], prepared["out_f"]
    in_p, out_p = prepared["in_p"], prepared["out_p"]
    w_dtype = prepared["weight_dtype"]
    w_bytes = w_dtype.itemsize
    out_dtype = x.dtype
    out_bytes = jnp.dtype(out_dtype).itemsize

    B = x.shape[0]
    # bf16 sublanes pack in pairs -> pad batch to 16 for a clean packed LHS.
    B_p = _round_up(B, 16 if w_bytes < 4 else 8)

    tn, tk, vmem_limit = _select_tiles(B_p, in_p, out_p, w_bytes, out_bytes,
                                       _vmem_capacity_bytes())
    n_j, n_k = out_p // tn, in_p // tk

    # Per-call small-tensor prep (O(B*in + out) bytes): pad x / eps, fold eps_p
    # into the activations and eps_q into the bias.  Weights are NOT touched.
    x_pad = jnp.pad(x.astype(jnp.float32), ((0, B_p - B), (0, in_p - in_f)))
    eps_p_pad = jnp.pad(eps_p.astype(jnp.float32), (0, in_p - in_f))
    eps_q_pad = jnp.pad(eps_q.astype(jnp.float32),
                        (0, out_p - out_f)).reshape(1, out_p)
    x_mu = x_pad.astype(w_dtype)
    x_sig = (x_pad * eps_p_pad[None, :]).astype(w_dtype)
    bias_eff = (prepared["mu_bias"]
                + prepared["sigma_bias"] * eps_q_pad[0]).reshape(1, out_p)

    cost = pl.CostEstimate(
        flops=4 * B_p * in_p * out_p,                       # two matmuls
        transcendentals=0,
        bytes_accessed=(2 * in_p * out_p * w_bytes          # weight stream (dominant)
                        + 2 * B_p * in_p * w_bytes          # x_mu + x_sig (once)
                        + B_p * out_p * out_bytes
                        + 3 * out_p * 4),
    )

    out = pl.pallas_call(
        noisy_linear_kernel,
        out_shape=jax.ShapeDtypeStruct((B_p, out_p), out_dtype),
        grid=(n_j, n_k),
        in_specs=[
            pl.BlockSpec((B_p, in_p), lambda j, k: (0, 0)),   # x (fully resident)
            pl.BlockSpec((B_p, in_p), lambda j, k: (0, 0)),   # x*eps_p (fully resident)
            pl.BlockSpec((tk, tn), lambda j, k: (k, j)),      # mu_W^T tile
            pl.BlockSpec((tk, tn), lambda j, k: (k, j)),      # sigma_W^T tile
            pl.BlockSpec((1, tn), lambda j, k: (0, j)),       # folded effective bias
            pl.BlockSpec((1, tn), lambda j, k: (0, j)),       # eps_q row
        ],
        out_specs=pl.BlockSpec((B_p, tn), lambda j, k: (0, j)),
        scratch_shapes=[pltpu.VMEM((B_p, tn), jnp.float32),   # acc_mu
                        pltpu.VMEM((B_p, tn), jnp.float32)],  # acc_sig
        compiler_params=pltpu.CompilerParams(
            dimension_semantics=("parallel", "arbitrary"),
            vmem_limit_bytes=vmem_limit,
        ),
        cost_estimate=cost,
    )(x_mu, x_sig, prepared["mu_Wt"], prepared["sigma_Wt"], bias_eff, eps_q_pad)

    return out[:B, :out_f]


def noisy_linear_ref(x, mu_W, sigma_W, mu_bias, sigma_bias, eps_p, eps_q):
    """Pure-JAX reference of the training-mode PyTorch forward."""
    weight = mu_W + sigma_W * (eps_q[:, None] * eps_p[None, :])
    bias = mu_bias + sigma_bias * eps_q
    return x @ weight.T + bias


def make_params(key, in_features, out_features, sigma=0.5):
    """Deterministic re-implementation of NoisyLinear.reset() + sample()."""
    k_muw, k_mub, k_ep, k_eq = jax.random.split(key, 4)
    bound = 1.0 / jnp.sqrt(jnp.float32(in_features))

    mu_W = jax.random.uniform(k_muw, (out_features, in_features),
                              jnp.float32, -bound, bound)
    mu_bias = jax.random.uniform(k_mub, (out_features,),
                                 jnp.float32, -bound, bound)
    sigma_W = jnp.full((out_features, in_features),
                       sigma / jnp.sqrt(jnp.float32(in_features)), jnp.float32)
    sigma_bias = jnp.full((out_features,),
                          sigma / jnp.sqrt(jnp.float32(out_features)), jnp.float32)

    # f(x) = sign(normal) * sqrt(|normal|)  (factorized noise, sampled once)
    def f(k, shape):
        n = jax.random.normal(k, shape, jnp.float32)
        return jnp.sign(n) * jnp.sqrt(jnp.abs(n))

    eps_p = f(k_ep, (in_features,))
    eps_q = f(k_eq, (out_features,))
    return mu_W, sigma_W, mu_bias, sigma_bias, eps_p, eps_q


if __name__ == "__main__":
    key = jax.random.PRNGKey(0)
    k_x, k_p, k_x2, k_p2 = jax.random.split(key, 4)

    # Main check: lane-dense shapes (small RL-MLP sized layer), multi-tile grid.
    batch, in_features, out_features = 8, 384, 512
    x = jax.random.normal(k_x, (batch, in_features), jnp.float32)
    mu_W, sigma_W, mu_bias, sigma_bias, eps_p, eps_q = make_params(
        k_p, in_features, out_features, sigma=0.5)
    y_ref = noisy_linear_ref(x, mu_W, sigma_W, mu_bias, sigma_bias, eps_p, eps_q)

    # f32 weight streaming -- tight tolerance.
    prep_f32 = prepare_noisy_linear_params(mu_W, sigma_W, mu_bias, sigma_bias,
                                           weight_dtype=jnp.float32)
    y = jax.block_until_ready(noisy_linear_forward(x, prep_f32, eps_p, eps_q))
    assert y.shape == (batch, out_features)
    assert jnp.allclose(y, y_ref, atol=1e-4, rtol=1e-4), "f32 mismatch vs reference"

    # Default bf16 weight streaming (f32 MXU accumulation) -- looser tolerance.
    prep_bf16 = prepare_noisy_linear_params(mu_W, sigma_W, mu_bias, sigma_bias)
    y_bf16 = jax.block_until_ready(noisy_linear_forward(x, prep_bf16, eps_p, eps_q))
    assert jnp.allclose(y_bf16, y_ref, atol=1e-1, rtol=5e-2), "bf16 mismatch vs reference"

    # Odd (non-128-multiple) shapes exercise the zero-padding path.
    b2, in2, out2 = 5, 200, 300
    x2 = jax.random.normal(k_x2, (b2, in2), jnp.float32)
    raw2 = make_params(k_p2, in2, out2, sigma=0.5)
    prep2 = prepare_noisy_linear_params(*raw2[:4], weight_dtype=jnp.float32)
    y2 = jax.block_until_ready(noisy_linear_forward(x2, prep2, raw2[4], raw2[5]))
    y2_ref = noisy_linear_ref(x2, *raw2)
    assert jnp.allclose(y2, y2_ref, atol=1e-4, rtol=1e-4), "padded-shape mismatch vs reference"

    print("KERNEL_OK")
</pallas_src>

<mosaic_0001>
module attributes {stable_mosaic.version = 11 : i64} {
  func.func @noisy_linear_kernel(%arg0: i32, %arg1: i32, %arg2: memref<8x384xf32, #tpu.memory_space<vmem>>, %arg3: memref<8x384xf32, #tpu.memory_space<vmem>>, %arg4: memref<384x256xf32, #tpu.memory_space<vmem>>, %arg5: memref<384x256xf32, #tpu.memory_space<vmem>>, %arg6: memref<1x256xf32, #tpu.memory_space<vmem>>, %arg7: memref<1x256xf32, #tpu.memory_space<vmem>>, %arg8: memref<8x256xf32, #tpu.memory_space<vmem>>, %arg9: memref<8x256xf32, #tpu.memory_space<vmem>>, %arg10: memref<8x256xf32, #tpu.memory_space<vmem>>) attributes {dimension_semantics = [#tpu.dimension_semantics<parallel>, #tpu.dimension_semantics<arbitrary>], iteration_bounds = array<i64: 2, 1>, scalar_prefetch = 0 : i64, scratch_operands = 2 : i64, tpu.core_type = #tpu.core_type<tc>, window_params = [{pipeline_mode = #tpu.pipeline_mode<synchronous>, transform_indices = @transform_0, window_bounds = array<i64: 8, 384>}, {pipeline_mode = #tpu.pipeline_mode<synchronous>, transform_indices = @transform_1, window_bounds = array<i64: 8, 384>}, {transform_indices = @transform_2, window_bounds = array<i64: 384, 256>}, {transform_indices = @transform_3, window_bounds = array<i64: 384, 256>}, {transform_indices = @transform_4, window_bounds = array<i64: 1, 256>}, {transform_indices = @transform_5, window_bounds = array<i64: 1, 256>}, {transform_indices = @transform_6, window_bounds = array<i64: 8, 256>}]} {
    %c0_i32 = arith.constant 0 : i32
    %0 = arith.cmpi eq, %arg1, %c0_i32 : i32
    %1 = arith.extui %0 : i1 to i32
    %c0_i32_0 = arith.constant 0 : i32
    %2 = arith.cmpi ne, %1, %c0_i32_0 : i32
    scf.if %2 {
      %cst_17 = arith.constant 0.000000e+00 : f32
      %22 = vector.broadcast %cst_17 : f32 to vector<8x256xf32>
      %c0_18 = arith.constant 0 : index
      %c0_19 = arith.constant 0 : index
      %23 = vector.load %arg9[%c0_18, %c0_19] : memref<8x256xf32, #tpu.memory_space<vmem>>, vector<8x256xf32>
      tpu.vector_store %arg9[%c0_18, %c0_19], %22 {strides = array<i32>} : memref<8x256xf32, #tpu.memory_space<vmem>>, vector<8x256xf32>,
      %cst_20 = arith.constant 0.000000e+00 : f32
      %24 = vector.broadcast %cst_20 : f32 to vector<8x256xf32>
      %c0_21 = arith.constant 0 : index
      %c0_22 = arith.constant 0 : index
      %25 = vector.load %arg10[%c0_21, %c0_22] : memref<8x256xf32, #tpu.memory_space<vmem>>, vector<8x256xf32>
      tpu.vector_store %arg10[%c0_21, %c0_22], %24 {strides = array<i32>} : memref<8x256xf32, #tpu.memory_space<vmem>>, vector<8x256xf32>,
    } else {
    }
    %c384_i32 = arith.constant 384 : i32
    %3 = arith.muli %arg1, %c384_i32 : i32
    %4 = tpu.assume_multiple %3, 128 : i32
    %c0 = arith.constant 0 : index
    %5 = arith.index_cast %4 : i32 to index
    %6 = vector.load %arg2[%c0, %5] : memref<8x384xf32, #tpu.memory_space<vmem>>, vector<8x384xf32>
    %c0_1 = arith.constant 0 : index
    %7 = arith.index_cast %4 : i32 to index
    %8 = vector.load %arg3[%c0_1, %7] : memref<8x384xf32, #tpu.memory_space<vmem>>, vector<8x384xf32>
    %c0_2 = arith.constant 0 : index
    %c0_3 = arith.constant 0 : index
    %9 = vector.load %arg9[%c0_2, %c0_3] : memref<8x256xf32, #tpu.memory_space<vmem>>, vector<8x256xf32>
    %c0_4 = arith.constant 0 : index
    %c0_5 = arith.constant 0 : index
    %10 = vector.load %arg4[%c0_4, %c0_5] : memref<384x256xf32, #tpu.memory_space<vmem>>, vector<384x256xf32>
    %cst = arith.constant dense<0.000000e+00> : vector<8x256xf32>
    %11 = tpu.matmul %6, %10, %cst {dimension_numbers = #tpu.dot_dimension_numbers<[1], [0], [0], [1], [0, 0, 1, 1], [], []>} : vector<8x384xf32>, vector<384x256xf32>, vector<8x256xf32> -> vector<8x256xf32>
    %12 = arith.addf %9, %11 : vector<8x256xf32>
    %c0_6 = arith.constant 0 : index
    %c0_7 = arith.constant 0 : index
    %13 = vector.load %arg9[%c0_6, %c0_7] : memref<8x256xf32, #tpu.memory_space<vmem>>, vector<8x256xf32>
    tpu.vector_store %arg9[%c0_6, %c0_7], %12 {strides = array<i32>} : memref<8x256xf32, #tpu.memory_space<vmem>>, vector<8x256xf32>,
    %c0_8 = arith.constant 0 : index
    %c0_9 = arith.constant 0 : index
    %14 = vector.load %arg10[%c0_8, %c0_9] : memref<8x256xf32, #tpu.memory_space<vmem>>, vector<8x256xf32>
    %c0_10 = arith.constant 0 : index
    %c0_11 = arith.constant 0 : index
    %15 = vector.load %arg5[%c0_10, %c0_11] : memref<384x256xf32, #tpu.memory_space<vmem>>, vector<384x256xf32>
    %cst_12 = arith.constant dense<0.000000e+00> : vector<8x256xf32>
    %16 = tpu.matmul %8, %15, %cst_12 {dimension_numbers = #tpu.dot_dimension_numbers<[1], [0], [0], [1], [0, 0, 1, 1], [], []>} : vector<8x384xf32>, vector<384x256xf32>, vector<8x256xf32> -> vector<8x256xf32>
    %17 = arith.addf %14, %16 : vector<8x256xf32>
    %c0_13 = arith.constant 0 : index
    %c0_14 = arith.constant 0 : index
    %18 = vector.load %arg10[%c0_13, %c0_14] : memref<8x256xf32, #tpu.memory_space<vmem>>, vector<8x256xf32>
    tpu.vector_store %arg10[%c0_13, %c0_14], %17 {strides = array<i32>} : memref<8x256xf32, #tpu.memory_space<vmem>>, vector<8x256xf32>,
    %c0_i32_15 = arith.constant 0 : i32
    %19 = arith.cmpi eq, %arg1, %c0_i32_15 : i32
    %20 = arith.extui %19 : i1 to i32
    %c0_i32_16 = arith.constant 0 : i32
    %21 = arith.cmpi ne, %20, %c0_i32_16 : i32
    scf.if %21 {
      %c0_17 = arith.constant 0 : index
      %c0_18 = arith.constant 0 : index
      %22 = vector.load %arg9[%c0_17, %c0_18] : memref<8x256xf32, #tpu.memory_space<vmem>>, vector<8x256xf32>
      %c0_19 = arith.constant 0 : index
      %c0_20 = arith.constant 0 : index
      %23 = vector.load %arg7[%c0_19, %c0_20] : memref<1x256xf32, #tpu.memory_space<vmem>>, vector<1x256xf32>
      %c0_21 = arith.constant 0 : index
      %c0_22 = arith.constant 0 : index
      %24 = vector.load %arg10[%c0_21, %c0_22] : memref<8x256xf32, #tpu.memory_space<vmem>>, vector<8x256xf32>
      %25 = vector.broadcast %23 : vector<1x256xf32> to vector<8x256xf32>
      %26 = arith.mulf %25, %24 : vector<8x256xf32>
      %27 = arith.addf %22, %26 : vector<8x256xf32>
      %c0_23 = arith.constant 0 : index
      %c0_24 = arith.constant 0 : index
      %28 = vector.load %arg6[%c0_23, %c0_24] : memref<1x256xf32, #tpu.memory_space<vmem>>, vector<1x256xf32>
      %29 = vector.broadcast %28 : vector<1x256xf32> to vector<8x256xf32>
      %30 = arith.addf %27, %29 : vector<8x256xf32>
      %c0_25 = arith.constant 0 : index
      %c0_26 = arith.constant 0 : index
      %31 = vector.load %arg8[%c0_25, %c0_26] : memref<8x256xf32, #tpu.memory_space<vmem>>, vector<8x256xf32>
      tpu.vector_store %arg8[%c0_25, %c0_26], %30 {strides = array<i32>} : memref<8x256xf32, #tpu.memory_space<vmem>>, vector<8x256xf32>,
    } else {
    }
    return
  }
  func.func @transform_0(%arg0: i32, %arg1: i32) -> (i32, i32) {
    %c0_i32 = arith.constant 0 : i32
    %c0_i32_0 = arith.constant 0 : i32
    %c0_i32_1 = arith.constant 0 : i32
    return %c0_i32, %c0_i32_0 : i32, i32
  }
  func.func @transform_1(%arg0: i32, %arg1: i32) -> (i32, i32) {
    %c0_i32 = arith.constant 0 : i32
    %c0_i32_0 = arith.constant 0 : i32
    %c0_i32_1 = arith.constant 0 : i32
    return %c0_i32, %c0_i32_0 : i32, i32
  }
  func.func @transform_2(%arg0: i32, %arg1: i32) -> (i32, i32) {
    %c0_i32 = arith.constant 0 : i32
    return %arg1, %arg0 : i32, i32
  }
  func.func @transform_3(%arg0: i32, %arg1: i32) -> (i32, i32) {
    %c0_i32 = arith.constant 0 : i32
    return %arg1, %arg0 : i32, i32
  }
  func.func @transform_4(%arg0: i32, %arg1: i32) -> (i32, i32) {
    %c0_i32 = arith.constant 0 : i32
    %c0_i32_0 = arith.constant 0 : i32
    return %c0_i32, %arg0 : i32, i32
  }
  func.func @transform_5(%arg0: i32, %arg1: i32) -> (i32, i32) {
    %c0_i32 = arith.constant 0 : i32
    %c0_i32_0 = arith.constant 0 : i32
    return %c0_i32, %arg0 : i32, i32
  }
  func.func @transform_6(%arg0: i32, %arg1: i32) -> (i32, i32) {
    %c0_i32 = arith.constant 0 : i32
    %c0_i32_0 = arith.constant 0 : i32
    return %c0_i32, %arg0 : i32, i32
  }
}

</mosaic_0001>

<bundles_post_ra>
// kernel: tpu_custom_call.1
= control target key start
LH: loop header
LB: loop body
LE: loop exit
PB: predicated region body
PF: predicated region fallthrough
CT: control target
= control target key end

     0   :  { %s2171_s0 = inlined_call_operand.hbm [shape: f32[8,384], index: 0, kind: input, shape index: {}]   ;;  %s2172_s1 = inlined_call_operand.hbm [shape: f32[8,384], index: 1, kind: input, shape index: {}]   ;;  %s2173_s2 = inlined_call_operand.hbm [shape: f32[384,512], index: 2, kind: input, shape index: {}]   ;;  %s2174_s3 = inlined_call_operand.hbm [shape: f32[384,512], index: 3, kind: input, shape index: {}]   ;;  %s2175_s4 = inlined_call_operand.vmem [shape: f32[1,512], index: 4, kind: input, shape index: {}]   ;;  %s2176_s5 = inlined_call_operand.vmem [shape: f32[1,512], index: 5, kind: input, shape index: {}]   ;;  %s2177_s6 = inlined_call_operand.hbm [shape: f32[8,512], index: 6, kind: output, shape index: {}]  }
   0x1   :  { %2194 = sst [smem:[#allocation22_spill]] %s2171_s0 }
   0x2   :  { %2195 = sst [smem:[#allocation23_spill]] %s2173_s2 }
   0x3   :  { %2196 = sst [smem:[#allocation24_spill]] %s2177_s6 }
   0x4   :  { %11 = vsyncpa [#allocation5], 0 }
   0x5   :  { %12 = vsyncpa [#allocation8], 0 }
   0x6   :  { %13 = vsyncpa [#allocation6], 0 }
   0x7   :  { %15 = vsyncpa [#allocation6 + $0x1], 0  ;;  %s1670_s21 = smov 0   ;;  %s1672_s22 = smov 0  }
   0x8   :  { %s1674_s23 = smov 0   ;;  %s1676_s24 = smov 0  }
   0x9   :  { %s1678_s25 = smov 0   ;;  %s1680_s26 = smov 0  }
   0xa LB: > { %2197 = sst [smem:[#allocation16_spill]] %s1604_s21  ;;  %s1701_s27 = sadd.s32 4294967295, %s1624_s26   ;;  %s1624_s26 = sphi %s1680_s26, %s21_s26   ;;  %s1620_s25 = sphi %s1678_s25, %s2242_s25   ;;  %s1616_s24 = sphi %s1676_s24, %s2241_s24   ;;  %s1612_s23 = sphi %s1674_s23, %s2237_s23   ;;  %s1608_s22 = sphi %s1672_s22, %s2240_s22   ;;  %s1604_s21 = sphi %s1670_s21, %s2239_s21  }
   0xb   : > { %2198 = sst [smem:[#allocation17_spill]] %s1612_s23  ;;  %s1104_s28 = sadd.s32 4294967294, %s1624_s26  }
   0xc   : > { %2199 = sst [smem:[#allocation18_spill]] %s1624_s26  ;;  %p91_p0 = scmp.ne.s32.totalorder %s1612_s23, %s1608_s22 }
   0xd   : > { %p92_p1 = scmp.eq.s32.totalorder %s1624_s26, 0  ;;  %p97_p2 = scmp.ne.s32.totalorder %s1608_s22, %s1604_s21 }
   0xe   : > { %p2178_p3 = scmp.eq.s32.totalorder %s1701_s27, 0  ;;  %p201_p4 = scmp.eq.s32.totalorder %s1701_s27, 1 }
   0xf   : > { %p1712_p5 = por %p92_p1, %p91_p0  ;;  %p207_p6 = scmp.eq.s32.totalorder %s1104_s28, 1 }
  0x10   : > { %p1718_p7 = por %p2178_p3, %p97_p2  ;;  %p1722_p8 = por %p201_p4, %p91_p0 }
  0x11   : > { %p1726_p9 = por %p207_p6, %p97_p2  ;;  %p1105_p10 = scmp.ge.s32.totalorder %s1624_s26, 1 }
  0x12   : > { %s2201_s7 = scalar_select %p1718_p7, 1, 0 }
  0x13   : > { %s2202_s8 = scalar_select %p1722_p8, 1, 0 }
  0x14   : > { %s2203_s9 = scalar_select %p1726_p9, 1, 0 }
  0x15   : > { %p214_p11 = scmp.lt.s32.totalorder %s1624_s26, 3  ;;  %s1626_s11 = smov [#allocation4]  }
  0x16   : > { %2204 = sst [smem:[#allocation19_spill]] %s2203_s9  ;;  %s227_s12 = sshll.u32 %s1626_s11, 4  ;;  %s228_s12 = int_to_ptr.vmem [resolvable:$true] %s227_s12 }
  0x17   : > { %p1733_p13 = pnand %p1105_p10, %p214_p11  ;;  %p1360_p1 = scmp.lt.s32.totalorder %s1624_s26, 2 }
  0x18   : > { %s33_s15 = sadd.s32 1, %s1620_s25  ;;  %s2209_s0 = sld [smem:[#allocation22_spill]] }
  0x19   : > { %s2205_s10 = scalar_select %p1733_p13, 1, 0 }
  0x1a   : > { %p1340_p0 = pneg %p1733_p13  ;;  %p1742_p4 = pnand %p1360_p1, %p1712_p5 }
  0x1b   : > { %p1753_p6 = scmp.ge.s32.totalorder %s33_s15, 2 }
  0x1c   : > { %s2206_s13 = scalar_select %p1742_p4, 1, 0 }
  0x1d   : > { %p1748_p2 = pnand %p1340_p0, %p2178_p3 }
  0x1e   : > { %s2208_s16 = scalar_select %p1753_p6, 1, 0 }
  0x1f   : > { %s1418_s20 = scalar_lea.hbm %s2209_s0, 384  ;;  %p2185_p10 = pneg %p1748_p2 }
  0x20   : > { %p1419_p5 = scmp.ne.s32.totalorder %s2209_s0, %s1418_s20  ;;  %p1425_p0 = scmp.lt.u32.totalorder %s1418_s20, %s2209_s0 }
  0x22   : > { %p1421_p11 = pnand %p2185_p10, %p1419_p5 }
  0x24   : > { %p1422_p1 = pneg %p1421_p11 }
  0x26   : > { %p1427_p12 = pnand %p1425_p0, %p1422_p1 }
  0x28   : > { %1430 = shalt.err (!%p1427_p12)
}
  0x29   : > { %s1431_s17 = scalar_lea.vmem %s228_s12, 384  ;;  %p1439_p7 = scmp.lt.s32.totalorder %s228_s12, %s228_s12 }
  0x2a   : > { %p1432_p3 = scmp.ne.s32.totalorder %s228_s12, %s1431_s17  ;;  %p1440_p13 = scmp.lt.s32.totalorder %s1431_s17, %s1431_s17 }
  0x2c   : > { %p1434_p9 = pnand %p1432_p3, %p2185_p10  ;;  %p1441_p4 = por %p1440_p13, %p1439_p7 }
  0x2e   : > { %p1435_p8 = pneg %p1434_p9 }
  0x30   : > { %p1442_p6 = pnand %p1441_p4, %p1435_p8 }
  0x32   : > { %1445 = shalt.err (!%p1442_p6)
}
  0x33   : > { %1343 = dma.hbm_to_vmem [thread:$0]  (!%p1748_p2), %s2209_s0, 384, %s228_s12, [#allocation5]  }
  0x34   : > { %p2210_p3 = scmp.ne.s32.totalorder %s2208_s16, 0  ;;  %s251_s29 = sand.u32 1, %s1612_s23  }
  0x35   : > { %s1787_s20 = smul.u32 768, %s251_s29  ;;  %s2184_s28 = sshll.u32 %s1620_s25, 8 }
  0x36   : > { %s2244_s15 = smov (%p2210_p3, %s33_s15), 0  ;;  %s2212_s2 = sld [smem:[#allocation23_spill]] }
  0x37   : > { %2211 = sst [smem:[#allocation20_spill]] %s2244_s15  ;;  %s80_s17 = ssub.s32 %s1620_s25, %s2244_s15 }
  0x38   : > { %p82_p7 = scmp.eq.s32.totalorder %s80_s17, 0  ;;  %s2213_s19 = sadd.s32 1, %s1612_s23 }
  0x39   : > { %s253_s16 = scalar_lea.vmem [#allocation9], %s1787_s20  ;;  %s2215_s29 = sand.u32 1, %s1624_s26  }
  0x3a   : > { %s1800_s12 = scalar_select %p82_p7, %s1612_s23, %s2213_s19  }
  0x3b   : > { %s263_s0 = sshll.u32 %s253_s16, 4  ;;  %s1807_s17 = scalar_lea.sflag [#allocation5], %s2215_s29  ;;  %s1803_s0 = int_to_ptr.vmem [resolvable:$true] %s263_s0 }
  0x3c   : > { %s1795_s18 = scalar_lea.hbm %s2212_s2, %s2184_s28  ;;  %2214 = sst [smem:[#allocation21_spill]] %s1800_s12 }
  0x3d   : > { %s1446_s15 = scalar_lea.hbm %s1795_s18, 12288  ;;  %p2216_p9 = scmp.ne.s32.totalorder %s2206_s13, 0 }
  0x3e   : > { %p1447_p8 = scmp.ne.s32.totalorder %s1795_s18, %s1446_s15  ;;  %s1451_s19 = scalar_lea.hbm %s2212_s2, 24576 }
  0x3f   : > { %p2192_p12 = pneg %p2216_p9  ;;  %p1452_p6 = scmp.lt.u32.totalorder %s1795_s18, %s2212_s2 }
  0x40   : > { %p1453_p5 = scmp.lt.u32.totalorder %s1451_s19, %s1446_s15  ;;  %p1455_p1 = scmp.lt.u32.totalorder %s1446_s15, %s1795_s18 }
  0x41   : > { %p1449_p13 = pnand %p2192_p12, %p1447_p8 }
  0x42   : > { %p1454_p11 = por %p1453_p5, %p1452_p6 }
  0x43   : > { %p1450_p4 = pneg %p1449_p13 }
  0x44   : > { %p1456_p0 = por %p1455_p1, %p1454_p11 }
  0x46   : > { %p1457_p3 = pnand %p1456_p0, %p1450_p4 }
  0x48   : > { %1460 = shalt.err (!%p1457_p3)
}
  0x49   : > { %s1461_s16 = scalar_lea.vmem %s1803_s0, 12288  ;;  %s1627_s29 = smov [#allocation9]  }
  0x4a   : > { %p1462_p7 = scmp.ne.s32.totalorder %s1803_s0, %s1461_s16  ;;  %s1466_s30 = sshll.u32 %s1627_s29, 4  ;;  %s1467_s30 = int_to_ptr.vmem [resolvable:$false] %s1466_s30 }
  0x4b   : > { %s1468_s28 = scalar_lea.vmem %s1467_s30, 24576  ;;  %p1469_p10 = scmp.lt.s32.totalorder %s1803_s0, %s1467_s30 }
  0x4c   : > { %p1464_p8 = pnand %p1462_p7, %p2192_p12  ;;  %p1470_p6 = scmp.lt.s32.totalorder %s1468_s28, %s1461_s16 }
  0x4e   : > { %p1465_p13 = pneg %p1464_p8  ;;  %p1471_p5 = por %p1470_p6, %p1469_p10 }
  0x50   : > { %p1472_p11 = pnand %p1471_p5, %p1465_p13 }
  0x52   : > { %1475 = shalt.err (!%p1472_p11)
}
  0x53   : > { %s1628_s15 = smov 512   ;;  %s1629_s12 = smov 256  }
  0x54   : > { %s1630_s11 = smov 16   ;;  %s1631_s19 = smov [#allocation7]  }
  0x55   : > { %1350 = dma.hbm_to_vmem [thread:$0]  (!%p2216_p9), %s1795_s18, 12288, %s1803_s0, %s1807_s17, %s1628_s15, %s1629_s12, %s1630_s11  }
  0x56   : > { %s238_s29 = sshll.u32 %s1631_s19, 4  ;;  %s2217_s16 = sshll.u32 %s1620_s25, 8  ;;  %s239_s29 = int_to_ptr.vmem [resolvable:$true] %s238_s29 }
  0x57   : > { %s1843_s2 = scalar_lea.hbm %s2174_s3, %s2217_s16  ;;  %s1476_s9 = scalar_lea.hbm %s2172_s1, 384 }
  0x58   : > { %p1477_p10 = scmp.ne.s32.totalorder %s2172_s1, %s1476_s9  ;;  %p2218_p4 = pneg %p1748_p2 }
  0x59   : > { %p1483_p3 = scmp.lt.u32.totalorder %s1476_s9, %s2172_s1 }
  0x5a   : > { %p1479_p1 = pnand %p1477_p10, %p2218_p4 }
  0x5c   : > { %p1480_p0 = pneg %p1479_p1 }
  0x5e   : > { %p1485_p7 = pnand %p1483_p3, %p1480_p0 }
  0x60   : > { %1488 = shalt.err (!%p1485_p7)
}
  0x61   : > { %s1489_s19 = scalar_lea.vmem %s239_s29, 384  ;;  %p2219_p13 = pmov %p2218_p4 }
  0x62   : > { %p1490_p8 = scmp.ne.s32.totalorder %s239_s29, %s1489_s19  ;;  %p1497_p11 = scmp.lt.s32.totalorder %s239_s29, %s239_s29 }
  0x63   : > { %p1498_p12 = scmp.lt.s32.totalorder %s1489_s19, %s1489_s19 }
  0x64   : > { %p1492_p6 = pnand %p1490_p8, %p2219_p13 }
  0x65   : > { %p1499_p9 = por %p1498_p12, %p1497_p11 }
  0x66   : > { %p1493_p5 = pneg %p1492_p6 }
  0x68   : > { %p1500_p4 = pnand %p1499_p9, %p1493_p5 }
  0x6a   : > { %1503 = shalt.err (!%p1500_p4)
}
  0x6b   : > { %1346 = dma.hbm_to_vmem [thread:$0]  (!%p1748_p2), %s2172_s1, 384, %s239_s29, [#allocation8]  }
  0x6c   : > { %s277_s23 = scalar_lea.vmem [#allocation10], %s1787_s20  ;;  %s1504_s9 = scalar_lea.hbm %s1843_s2, 12288 }
  0x6d   : > { %s287_s26 = sshll.u32 %s277_s23, 4  ;;  %p1505_p12 = scmp.ne.s32.totalorder %s1843_s2, %s1504_s9  ;;  %s1866_s26 = int_to_ptr.vmem [resolvable:$true] %s287_s26 }
  0x6e   : > { %p2220_p9 = scmp.ne.s32.totalorder %s2206_s13, 0  ;;  %s1509_s30 = scalar_lea.hbm %s2174_s3, 24576 }
  0x6f   : > { %p1510_p3 = scmp.lt.u32.totalorder %s1843_s2, %s2174_s3  ;;  %p1511_p7 = scmp.lt.u32.totalorder %s1509_s30, %s1504_s9 }
  0x70   : > { %p2221_p10 = pneg %p2220_p9  ;;  %p1513_p8 = scmp.lt.u32.totalorder %s1504_s9, %s1843_s2 }
  0x71   : > { %p1512_p2 = por %p1511_p7, %p1510_p3 }
  0x72   : > { %p1507_p1 = pnand %p1505_p12, %p2221_p10 }
  0x73   : > { %p1514_p13 = por %p1513_p8, %p1512_p2 }
  0x74   : > { %p1508_p0 = pneg %p1507_p1 }
  0x76   : > { %p1515_p6 = pnand %p1514_p13, %p1508_p0 }
  0x78   : > { %1518 = shalt.err (!%p1515_p6)
}
  0x79   : > { %s1519_s20 = scalar_lea.vmem %s1866_s26, 12288  ;;  %p2222_p11 = pmov %p2221_p10 }
  0x7a   : > { %p1520_p5 = scmp.ne.s32.totalorder %s1866_s26, %s1519_s20  ;;  %s1632_s29 = smov [#allocation10]  }
  0x7b   : > { %s1524_s18 = sshll.u32 %s1632_s29, 4  ;;  %s1525_s18 = int_to_ptr.vmem [resolvable:$false] %s1524_s18 }
  0x7c   : > { %p1522_p4 = pnand %p1520_p5, %p2222_p11  ;;  %s1526_s19 = scalar_lea.vmem %s1525_s18, 24576 }
  0x7d   : > { %p1527_p10 = scmp.lt.s32.totalorder %s1866_s26, %s1525_s18  ;;  %p1528_p1 = scmp.lt.s32.totalorder %s1526_s19, %s1519_s20 }
  0x7e   : > { %p1523_p12 = pneg %p1522_p4 }
  0x7f   : > { %p1529_p3 = por %p1528_p1, %p1527_p10 }
  0x81   : > { %p1530_p7 = pnand %p1529_p3, %p1523_p12 }
  0x83   : > { %1533 = shalt.err (!%p1530_p7)
}
  0x84   : > { %1353 = dma.hbm_to_vmem [thread:$0]  (!%p2220_p9), %s1843_s2, 12288, %s1866_s26, %s1807_s17, %s1628_s15, %s1629_s12, %s1630_s11  }
  0x85   : > { %p2223_p0 = scmp.ne.s32.totalorder %s2205_s10, 0 }
  0x86   : > { %p2224_p2 = scmp.eq.s32.totalorder (!%p2223_p0), %s1701_s27, 0 }
  0x87   : > { %315 = sbr.rel (%p2223_p0) target bundleno = 485 (0x1e5), region = 44 }
  0x8e   : > { %1587 = dma.done.wait (%p2224_p2), [#allocation5], 384   ;;  %p2225_p8 = pmov %p2224_p2 }
  0x8f   : > { %p2226_p13 = pmov %p2224_p2 }
  0x90   : > { %1589 = vsyncadd (%p2225_p8), [#allocation5], 4294966912 }
  0x91   : > { %1591 = dma.done.wait (%p2226_p13), [#allocation8], 384   ;;  %p2227_p6 = pmov %p2224_p2 }
  0x92   : > { %s325_s13 = sand.u32 1, %s1701_s27   ;;  %s1907_s2 = sand.u32 1, %s1608_s22  }
  0x93   : > { %1593 = vsyncadd (%p2227_p6), [#allocation8], 4294966912  ;;  %s1325_s10 = smul.u32 768, %s1907_s2  ;;  %s326_s17 = scalar_lea.sflag [#allocation5], %s325_s13 }
  0x94   : > { %p2228_p9 = scmp.ne.s32.totalorder %s2201_s7, 0 }
  0x95   : > { %s1910_s15 = scalar_lea.vmem [#allocation9], %s1325_s10 }
  0x96   : > { %1595 = dma.done.wait (%p2228_p9), %s326_s17, 24576  }
  0x97   : > { %1597 = vsyncadd (%p2228_p9), %s326_s17, 4294942720  ;;  %v419_v0 = vld [vmem:[%s1910_s15 + $0x8] sm:$0xff]  ;;  %v421_v1 = vld [vmem:[%s1910_s15 + $0x18] sm:$0xff]  ;;  %s1918_s27 = scalar_lea.vmem [#allocation10], %s1325_s10  ;;  %s1117_s7 = sshll.u32 %s1616_s24, 1 }
  0x98   : > { %v663_v2 = vld [vmem:[%s1918_s27 + $0x8] sm:$0xff]  ;;  %v1127_v3 = vpack.c.bf16 %v421_v1, %v419_v0  ;;  %v665_v4 = vld [vmem:[%s1918_s27 + $0x18] sm:$0xff]  ;;  %v418_v5 = vld [vmem:[%s1910_s15] sm:$0xff]  ;;  %p385_p5 = scmp.lt.s32.totalorder %s1117_s7, 3  ;;  %s1116_s9 = sshll.u32 %s1907_s2, 4 }
  0x99   : > { %v420_v6 = vld [vmem:[%s1910_s15 + $0x10] sm:$0xff]  ;;  %v1223_v7 = vpack.c.bf16 %v665_v4, %v663_v2  ;;  %v662_v9 = vld [vmem:[%s1918_s27] sm:$0xff]  ;;  %v423_v11 = vld [vmem:[%s1910_s15 + $0x28] sm:$0xff]  ;;  %s1126_s14 = sshll.u32 %s1616_s24, 8  ;;  %s379_s16 = scalar_lea.vmem [#allocation11], %s1116_s9 }
  0x9a   : > { %v1129_v8 = vpack.c.bf16 %v420_v6, %v418_v5  ;;  %v664_v10 = vld [vmem:[%s1918_s27 + $0x10] sm:$0xff]  ;;  %1128 = vmatprep.subr.bf16.mxu0 %v1127_v3  ;;  %v425_v13 = vld [vmem:[%s1910_s15 + $0x38] sm:$0xff]  ;;  %v667_v14 = vld [vmem:[%s1918_s27 + $0x28] sm:$0xff]  ;;  %s2246_s7 = smov (!%p385_p5, %s1117_s7), 3  ;;  %s958_s30 = sshll.u32 %s379_s16, 4  ;;  %s2124_s30 = int_to_ptr.vmem [resolvable:$true] %s958_s30 }
  0x9b   : > { %v1225_v12 = vpack.c.bf16 %v664_v10, %v662_v9  ;;  %v669_v15 = vld [vmem:[%s1918_s27 + $0x38] sm:$0xff]  ;;  %1224 = vmatprep.subr.bf16.mxu1 %v1223_v7  ;;  %v1131_v16 = vpack.c.bf16 %v425_v13, %v423_v11  ;;  %v422_v18 = vld [vmem:[%s1910_s15 + $0x20] sm:$0xff]  ;;  %v424_v19 = vld [vmem:[%s1910_s15 + $0x30] sm:$0xff]  ;;  %s392_s6 = scalar_lea.vmem %s2176_s5, %s2246_s7  ;;  %s387_s26 = scalar_lea.vmem %s2175_s4, %s2246_s7 }
  0x9c   : > { %1130 = vmatpush1.bf16.msra.mxu0 %v1129_v8  ;;  %v1227_v17 = vpack.c.bf16 %v669_v15, %v667_v14  ;;  %v666_v20 = vld [vmem:[%s1918_s27 + $0x20] sm:$0xff]  ;;  %v1133_v21 = vpack.c.bf16 %v424_v19, %v422_v18  ;;  %v668_v22 = vld [vmem:[%s1918_s27 + $0x30] sm:$0xff]  ;;  %v427_v23 = vld [vmem:[%s1910_s15 + $0x48] sm:$0xff]  ;;  %s2229_s20 = sld [smem:[#allocation24_spill]]  ;;  %s944_s18 = scalar_lea.sflag [#allocation6], %s1907_s2 }
  0x9d   : > { %1226 = vmatpush1.bf16.msra.mxu1 %v1225_v12  ;;  %v429_v24 = vld [vmem:[%s1910_s15 + $0x58] sm:$0xff]  ;;  %1132 = vmatprep.subr.bf16.mxu0 %v1131_v16  ;;  %v1229_v25 = vpack.c.bf16 %v668_v22, %v666_v20  ;;  %v671_v27 = vld [vmem:[%s1918_s27 + $0x48] sm:$0xff]  ;;  %v426_v29 = vld [vmem:[%s1910_s15 + $0x40] sm:$0xff]  ;;  %s1534_s19 = scalar_lea.vmem %s2124_s30, 256  ;;  %p2230_p4 = scmp.ne.s32.totalorder %s2202_s8, 0 }
  0x9e   : > { %1228 = vmatprep.subr.bf16.mxu1 %v1227_v17  ;;  %v1135_v26 = vpack.c.bf16 %v429_v24, %v427_v23  ;;  %v673_v28 = vld [vmem:[%s1918_s27 + $0x58] sm:$0xff]  ;;  %v428_v31 = vld [vmem:[%s1910_s15 + $0x50] sm:$0xff]  ;;  %v670_v32 = vld [vmem:[%s1918_s27 + $0x40] sm:$0xff]  ;;  %p1535_p11 = scmp.ne.s32.totalorder %s2124_s30, %s1534_s19  ;;  %s1634_s24 = smov [#allocation11]  }
  0x9f   : > { %v1231_v30 = vpack.c.bf16 %v673_v28, %v671_v27  ;;  %v672_v33 = vld [vmem:[%s1918_s27 + $0x50] sm:$0xff]  ;;  %v1137_v34 = vpack.c.bf16 %v428_v31, %v426_v29  ;;  %v431_v35 = vld [vmem:[%s1910_s15 + $0x68] sm:$0xff]  ;;  %v433_v36 = vld [vmem:[%s1910_s15 + $0x78] sm:$0xff]  ;;  %s1538_s13 = sshll.u32 %s1634_s24, 4  ;;  %s1539_s13 = int_to_ptr.vmem [resolvable:$false] %s1538_s13 }
  0xa0   : > { %1134 = vmatpush1.bf16.msra.mxu0 %v1133_v21  ;;  %v675_v37 = vld [vmem:[%s1918_s27 + $0x68] sm:$0xff]  ;;  %v1233_v38 = vpack.c.bf16 %v672_v33, %v670_v32  ;;  %v1139_v39 = vpack.c.bf16 %v433_v36, %v431_v35  ;;  %v677_v40 = vld [vmem:[%s1918_s27 + $0x78] sm:$0xff]  ;;  %v430_v41 = vld [vmem:[%s1910_s15 + $0x60] sm:$0xff]  ;;  %p1536_p12 = pnand %p1535_p11, %p2230_p4  ;;  %s1540_s10 = scalar_lea.vmem %s1539_s13, 512 }
  0xa1   : > { %1230 = vmatpush1.bf16.msra.mxu1 %v1229_v25  ;;  %1136 = vmatprep.subr.bf16.mxu0 %v1135_v26  ;;  %v432_v42 = vld [vmem:[%s1910_s15 + $0x70] sm:$0xff]  ;;  %v1235_v43 = vpack.c.bf16 %v677_v40, %v675_v37  ;;  %v674_v44 = vld [vmem:[%s1918_s27 + $0x60] sm:$0xff]  ;;  %v435_v46 = vld [vmem:[%s1910_s15 + $0x88] sm:$0xff]  ;;  %p1541_p1 = scmp.lt.s32.totalorder %s2124_s30, %s1539_s13  ;;  %p1542_p3 = scmp.lt.s32.totalorder %s1540_s10, %s1534_s19 }
  0xa2   : > { %1232 = vmatprep.subr.bf16.mxu1 %v1231_v30  ;;  %v676_v45 = vld [vmem:[%s1918_s27 + $0x70] sm:$0xff]  ;;  %v437_v47 = vld [vmem:[%s1910_s15 + $0x98] sm:$0xff]  ;;  %v679_v48 = vld [vmem:[%s1918_s27 + $0x88] sm:$0xff]  ;;  %v1141_v50 = vpack.c.bf16 %v432_v42, %v430_v41  ;;  %s2122_s29 = scalar_lea.hbm %s2229_s20, %s1126_s14  ;;  %p1537_p10 = pneg %p1536_p12 }
  0xa3   : > { %v681_v49 = vld [vmem:[%s1918_s27 + $0x98] sm:$0xff]  ;;  %v1237_v51 = vpack.c.bf16 %v676_v45, %v674_v44  ;;  %v1143_v52 = vpack.c.bf16 %v437_v47, %v435_v46  ;;  %v434_v53 = vld [vmem:[%s1910_s15 + $0x80] sm:$0xff]  ;;  %v436_v54 = vld [vmem:[%s1910_s15 + $0x90] sm:$0xff]  ;;  %p1543_p7 = por %p1542_p3, %p1541_p1 }
  0xa4   : > { %1138 = vmatpush1.bf16.msra.mxu0 %v1137_v34  ;;  %v678_v55 = vld [vmem:[%s1918_s27 + $0x80] sm:$0xff]  ;;  %v1239_v56 = vpack.c.bf16 %v681_v49, %v679_v48  ;;  %v680_v57 = vld [vmem:[%s1918_s27 + $0x90] sm:$0xff]  ;;  %v439_v58 = vld [vmem:[%s1910_s15 + $0xa8] sm:$0xff]  ;;  %v1145_v62 = vpack.c.bf16 %v436_v54, %v434_v53 }
  0xa5   : > { %1234 = vmatpush1.bf16.msra.mxu1 %v1233_v38  ;;  %1140 = vmatprep.subr.bf16.mxu0 %v1139_v39  ;;  %v441_v59 = vld [vmem:[%s1910_s15 + $0xb8] sm:$0xff]  ;;  %v683_v60 = vld [vmem:[%s1918_s27 + $0xa8] sm:$0xff]  ;;  %v1241_v63 = vpack.c.bf16 %v680_v57, %v678_v55  ;;  %v438_v1 = vld [vmem:[%s1910_s15 + $0xa0] sm:$0xff]  ;;  %p1544_p0 = pnand %p1543_p7, %p1537_p10 }
  0xa6   : > { %1236 = vmatprep.subr.bf16.mxu1 %v1235_v43  ;;  %v685_v61 = vld [vmem:[%s1918_s27 + $0xb8] sm:$0xff]  ;;  %v1147_v0 = vpack.c.bf16 %v441_v59, %v439_v58  ;;  %v440_v2 = vld [vmem:[%s1910_s15 + $0xb0] sm:$0xff]  ;;  %v682_v3 = vld [vmem:[%s1918_s27 + $0xa0] sm:$0xff] }
  0xa7   : > { %v1243_v4 = vpack.c.bf16 %v685_v61, %v683_v60  ;;  %v684_v5 = vld [vmem:[%s1918_s27 + $0xb0] sm:$0xff]  ;;  %v443_v6 = vld [vmem:[%s1910_s15 + $0xc8] sm:$0xff]  ;;  %v445_v7 = vld [vmem:[%s1910_s15 + $0xd8] sm:$0xff]  ;;  %v1149_v10 = vpack.c.bf16 %v440_v2, %v438_v1 }
  0xa8   : > { %1142 = vmatpush1.bf16.msra.mxu0 %v1141_v50  ;;  %v687_v8 = vld [vmem:[%s1918_s27 + $0xc8] sm:$0xff]  ;;  %v689_v9 = vld [vmem:[%s1918_s27 + $0xd8] sm:$0xff]  ;;  %v1245_v11 = vpack.c.bf16 %v684_v5, %v682_v3  ;;  %v1151_v12 = vpack.c.bf16 %v445_v7, %v443_v6  ;;  %v442_v13 = vld [vmem:[%s1910_s15 + $0xc0] sm:$0xff] }
  0xa9   : > { %1238 = vmatpush1.bf16.msra.mxu1 %v1237_v51  ;;  %1144 = vmatprep.subr.bf16.mxu0 %v1143_v52  ;;  %v444_v14 = vld [vmem:[%s1910_s15 + $0xd0] sm:$0xff]  ;;  %v686_v15 = vld [vmem:[%s1918_s27 + $0xc0] sm:$0xff]  ;;  %v1247_v16 = vpack.c.bf16 %v689_v9, %v687_v8  ;;  %v447_v18 = vld [vmem:[%s1910_s15 + $0xe8] sm:$0xff] }
  0xaa   : > { %1240 = vmatprep.subr.bf16.mxu1 %v1239_v56  ;;  %v688_v17 = vld [vmem:[%s1918_s27 + $0xd0] sm:$0xff]  ;;  %v449_v19 = vld [vmem:[%s1910_s15 + $0xf8] sm:$0xff]  ;;  %v691_v20 = vld [vmem:[%s1918_s27 + $0xe8] sm:$0xff]  ;;  %v1153_v22 = vpack.c.bf16 %v444_v14, %v442_v13 }
  0xab   : > { %v693_v21 = vld [vmem:[%s1918_s27 + $0xf8] sm:$0xff]  ;;  %v1249_v23 = vpack.c.bf16 %v688_v17, %v686_v15  ;;  %v1155_v24 = vpack.c.bf16 %v449_v19, %v447_v18  ;;  %v446_v25 = vld [vmem:[%s1910_s15 + $0xe0] sm:$0xff]  ;;  %v448_v26 = vld [vmem:[%s1910_s15 + $0xf0] sm:$0xff] }
  0xac   : > { %1146 = vmatpush1.bf16.msra.mxu0 %v1145_v62  ;;  %v690_v27 = vld [vmem:[%s1918_s27 + $0xe0] sm:$0xff]  ;;  %v1251_v28 = vpack.c.bf16 %v693_v21, %v691_v20  ;;  %v692_v29 = vld [vmem:[%s1918_s27 + $0xf0] sm:$0xff]  ;;  %v451_v30 = vld [vmem:[%s1910_s15 + $0x108] sm:$0xff]  ;;  %v1157_v34 = vpack.c.bf16 %v448_v26, %v446_v25 }
  0xad   : > { %1242 = vmatpush1.bf16.msra.mxu1 %v1241_v63  ;;  %1148 = vmatprep.subr.bf16.mxu0 %v1147_v0  ;;  %v453_v31 = vld [vmem:[%s1910_s15 + $0x118] sm:$0xff]  ;;  %v695_v32 = vld [vmem:[%s1918_s27 + $0x108] sm:$0xff]  ;;  %v1253_v35 = vpack.c.bf16 %v692_v29, %v690_v27  ;;  %v450_v37 = vld [vmem:[%s1910_s15 + $0x100] sm:$0xff] }
  0xae   : > { %1244 = vmatprep.subr.bf16.mxu1 %v1243_v4  ;;  %v697_v33 = vld [vmem:[%s1918_s27 + $0x118] sm:$0xff]  ;;  %v1159_v36 = vpack.c.bf16 %v453_v31, %v451_v30  ;;  %v452_v38 = vld [vmem:[%s1910_s15 + $0x110] sm:$0xff]  ;;  %v694_v39 = vld [vmem:[%s1918_s27 + $0x100] sm:$0xff] }
  0xaf   : > { %v1255_v40 = vpack.c.bf16 %v697_v33, %v695_v32  ;;  %v696_v41 = vld [vmem:[%s1918_s27 + $0x110] sm:$0xff]  ;;  %v455_v42 = vld [vmem:[%s1910_s15 + $0x128] sm:$0xff]  ;;  %v457_v43 = vld [vmem:[%s1910_s15 + $0x138] sm:$0xff]  ;;  %v1161_v46 = vpack.c.bf16 %v452_v38, %v450_v37 }
  0xb0   : > { %1150 = vmatpush1.bf16.msra.mxu0 %v1149_v10  ;;  %v699_v44 = vld [vmem:[%s1918_s27 + $0x128] sm:$0xff]  ;;  %v701_v45 = vld [vmem:[%s1918_s27 + $0x138] sm:$0xff]  ;;  %v1257_v47 = vpack.c.bf16 %v696_v41, %v694_v39  ;;  %v1163_v48 = vpack.c.bf16 %v457_v43, %v455_v42  ;;  %v454_v49 = vld [vmem:[%s1910_s15 + $0x120] sm:$0xff] }
  0xb1   : > { %1246 = vmatpush1.bf16.msra.mxu1 %v1245_v11  ;;  %1152 = vmatprep.subr.bf16.mxu0 %v1151_v12  ;;  %v456_v50 = vld [vmem:[%s1910_s15 + $0x130] sm:$0xff]  ;;  %v698_v51 = vld [vmem:[%s1918_s27 + $0x120] sm:$0xff]  ;;  %v1259_v52 = vpack.c.bf16 %v701_v45, %v699_v44  ;;  %v459_v54 = vld [vmem:[%s1910_s15 + $0x148] sm:$0xff] }
  0xb2   : > { %1248 = vmatprep.subr.bf16.mxu1 %v1247_v16  ;;  %v700_v53 = vld [vmem:[%s1918_s27 + $0x130] sm:$0xff]  ;;  %v461_v55 = vld [vmem:[%s1910_s15 + $0x158] sm:$0xff]  ;;  %v703_v56 = vld [vmem:[%s1918_s27 + $0x148] sm:$0xff]  ;;  %v1165_v58 = vpack.c.bf16 %v456_v50, %v454_v49 }
  0xb3   : > { %v705_v57 = vld [vmem:[%s1918_s27 + $0x158] sm:$0xff]  ;;  %v1261_v59 = vpack.c.bf16 %v700_v53, %v698_v51  ;;  %v1167_v60 = vpack.c.bf16 %v461_v55, %v459_v54  ;;  %v458_v61 = vld [vmem:[%s1910_s15 + $0x140] sm:$0xff]  ;;  %v460_v62 = vld [vmem:[%s1910_s15 + $0x150] sm:$0xff] }
  0xb4   : > { %1154 = vmatpush1.bf16.msra.mxu0 %v1153_v22  ;;  %v702_v63 = vld [vmem:[%s1918_s27 + $0x140] sm:$0xff]  ;;  %v1263_v0 = vpack.c.bf16 %v705_v57, %v703_v56  ;;  %v704_v1 = vld [vmem:[%s1918_s27 + $0x150] sm:$0xff]  ;;  %v463_v2 = vld [vmem:[%s1910_s15 + $0x168] sm:$0xff]  ;;  %v1169_v6 = vpack.c.bf16 %v460_v62, %v458_v61 }
  0xb5   : > { %1250 = vmatpush1.bf16.msra.mxu1 %v1249_v23  ;;  %1156 = vmatprep.subr.bf16.mxu0 %v1155_v24  ;;  %v465_v3 = vld [vmem:[%s1910_s15 + $0x178] sm:$0xff]  ;;  %v707_v4 = vld [vmem:[%s1918_s27 + $0x168] sm:$0xff]  ;;  %v462_v7 = vld [vmem:[%s1910_s15 + $0x160] sm:$0xff]  ;;  %v1265_v8 = vpack.c.bf16 %v704_v1, %v702_v63 }
  0xb6   : > { %1252 = vmatprep.subr.bf16.mxu1 %v1251_v28  ;;  %v709_v5 = vld [vmem:[%s1918_s27 + $0x178] sm:$0xff]  ;;  %v1171_v9 = vpack.c.bf16 %v465_v3, %v463_v2  ;;  %v464_v10 = vld [vmem:[%s1910_s15 + $0x170] sm:$0xff]  ;;  %v706_v11 = vld [vmem:[%s1918_s27 + $0x160] sm:$0xff] }
  0xb7   : > { %v708_v12 = vld [vmem:[%s1918_s27 + $0x170] sm:$0xff]  ;;  %v1267_v13 = vpack.c.bf16 %v709_v5, %v707_v4  ;;  %v467_v14 = vld [vmem:[%s1910_s15 + $0x188] sm:$0xff]  ;;  %v469_v15 = vld [vmem:[%s1910_s15 + $0x198] sm:$0xff]  ;;  %v1173_v20 = vpack.c.bf16 %v464_v10, %v462_v7 }
  0xb8   : > { %1158 = vmatpush1.bf16.msra.mxu0 %v1157_v34  ;;  %v409_v16 = vld [vmem:[#allocation4 + $0x8] sm:$0xff]  ;;  %v711_v17 = vld [vmem:[%s1918_s27 + $0x188] sm:$0xff]  ;;  %v414_v19 = vld [vmem:[#allocation7 + $0x8] sm:$0xff]  ;;  %v1269_v21 = vpack.c.bf16 %v708_v12, %v706_v11  ;;  %v1175_v22 = vpack.c.bf16 %v469_v15, %v467_v14 }
  0xb9   : > { %1254 = vmatpush1.bf16.msra.mxu1 %v1253_v35  ;;  %1160 = vmatprep.subr.bf16.mxu0 %v1159_v36  ;;  %v713_v18 = vld [vmem:[%s1918_s27 + $0x198] sm:$0xff]  ;;  %v466_v23 = vld [vmem:[%s1910_s15 + $0x180] sm:$0xff]  ;;  %v468_v24 = vld [vmem:[%s1910_s15 + $0x190] sm:$0xff] }
  0xba   : > { %1256 = vmatprep.subr.bf16.mxu1 %v1255_v40  ;;  %578 = vmatprep.mubr.f32.mxu0 %v409_v16  ;;  %v710_v25 = vld [vmem:[%s1918_s27 + $0x180] sm:$0xff]  ;;  %v1271_v26 = vpack.c.bf16 %v713_v18, %v711_v17  ;;  %v712_v27 = vld [vmem:[%s1918_s27 + $0x190] sm:$0xff]  ;;  %v471_v28 = vld [vmem:[%s1910_s15 + $0x1a8] sm:$0xff]  ;;  %v1177_v32 = vpack.c.bf16 %v468_v24, %v466_v23 }
  0xbb   : > { %822 = vmatprep.mubr.f32.mxu1 %v414_v19  ;;  %v473_v29 = vld [vmem:[%s1910_s15 + $0x1b8] sm:$0xff]  ;;  %v715_v30 = vld [vmem:[%s1918_s27 + $0x1a8] sm:$0xff]  ;;  %v1273_v33 = vpack.c.bf16 %v712_v27, %v710_v25  ;;  %v470_v35 = vld [vmem:[%s1910_s15 + $0x1a0] sm:$0xff] }
  0xbc   : > { %1162 = vmatpush1.bf16.msra.mxu0 %v1161_v46  ;;  %v717_v31 = vld [vmem:[%s1918_s27 + $0x1b8] sm:$0xff]  ;;  %v1179_v34 = vpack.c.bf16 %v473_v29, %v471_v28  ;;  %v472_v36 = vld [vmem:[%s1910_s15 + $0x1b0] sm:$0xff]  ;;  %v714_v37 = vld [vmem:[%s1918_s27 + $0x1a0] sm:$0xff] }
  0xbd   : > { %1258 = vmatpush1.bf16.msra.mxu1 %v1257_v47  ;;  %1164 = vmatprep.subr.bf16.mxu0 %v1163_v48  ;;  %v1275_v38 = vpack.c.bf16 %v717_v31, %v715_v30  ;;  %v716_v39 = vld [vmem:[%s1918_s27 + $0x1b0] sm:$0xff]  ;;  %v475_v40 = vld [vmem:[%s1910_s15 + $0x1c8] sm:$0xff]  ;;  %v477_v41 = vld [vmem:[%s1910_s15 + $0x1d8] sm:$0xff]  ;;  %v1181_v44 = vpack.c.bf16 %v472_v36, %v470_v35 }
  0xbe   : > { %1260 = vmatprep.subr.bf16.mxu1 %v1259_v52  ;;  %v719_v42 = vld [vmem:[%s1918_s27 + $0x1c8] sm:$0xff]  ;;  %v721_v43 = vld [vmem:[%s1918_s27 + $0x1d8] sm:$0xff]  ;;  %v1277_v45 = vpack.c.bf16 %v716_v39, %v714_v37  ;;  %v1183_v46 = vpack.c.bf16 %v477_v41, %v475_v40  ;;  %v474_v47 = vld [vmem:[%s1910_s15 + $0x1c0] sm:$0xff]  ;;  %v1633_v40 = vmov 0.0  }
  0xbf   : > { %v476_v48 = vld [vmem:[%s1910_s15 + $0x1d0] sm:$0xff]  ;;  %v718_v49 = vld [vmem:[%s1918_s27 + $0x1c0] sm:$0xff]  ;;  %v1279_v50 = vpack.c.bf16 %v721_v43, %v719_v42  ;;  %v479_v52 = vld [vmem:[%s1910_s15 + $0x1e8] sm:$0xff] }
  0xc0   : > { %1166 = vmatpush1.bf16.msra.mxu0 %v1165_v58  ;;  %v720_v51 = vld [vmem:[%s1918_s27 + $0x1d0] sm:$0xff]  ;;  %v481_v53 = vld [vmem:[%s1910_s15 + $0x1f8] sm:$0xff]  ;;  %v723_v54 = vld [vmem:[%s1918_s27 + $0x1e8] sm:$0xff]  ;;  %v1185_v56 = vpack.c.bf16 %v476_v48, %v474_v47 }
  0xc1   : > { %1262 = vmatpush1.bf16.msra.mxu1 %v1261_v59  ;;  %1168 = vmatprep.subr.bf16.mxu0 %v1167_v60  ;;  %v725_v55 = vld [vmem:[%s1918_s27 + $0x1f8] sm:$0xff]  ;;  %v1281_v57 = vpack.c.bf16 %v720_v51, %v718_v49  ;;  %v1187_v58 = vpack.c.bf16 %v481_v53, %v479_v52  ;;  %v478_v59 = vld [vmem:[%s1910_s15 + $0x1e0] sm:$0xff]  ;;  %v480_v60 = vld [vmem:[%s1910_s15 + $0x1f0] sm:$0xff] }
  0xc2   : > { %1264 = vmatprep.subr.bf16.mxu1 %v1263_v0  ;;  %v722_v61 = vld [vmem:[%s1918_s27 + $0x1e0] sm:$0xff]  ;;  %v1283_v62 = vpack.c.bf16 %v725_v55, %v723_v54  ;;  %v724_v63 = vld [vmem:[%s1918_s27 + $0x1f0] sm:$0xff]  ;;  %v483_v0 = vld [vmem:[%s1910_s15 + $0x208] sm:$0xff]  ;;  %v1189_v4 = vpack.c.bf16 %v480_v60, %v478_v59 }
  0xc3   : > { %v485_v1 = vld [vmem:[%s1910_s15 + $0x218] sm:$0xff]  ;;  %v727_v2 = vld [vmem:[%s1918_s27 + $0x208] sm:$0xff]  ;;  %v1285_v5 = vpack.c.bf16 %v724_v63, %v722_v61  ;;  %v482_v7 = vld [vmem:[%s1910_s15 + $0x200] sm:$0xff] }
  0xc4   : > { %1170 = vmatpush1.bf16.msra.mxu0 %v1169_v6  ;;  %v729_v3 = vld [vmem:[%s1918_s27 + $0x218] sm:$0xff]  ;;  %v1191_v6 = vpack.c.bf16 %v485_v1, %v483_v0  ;;  %v728_v11 = vld [vmem:[%s1918_s27 + $0x210] sm:$0xff]  ;;  %v487_v12 = vld [vmem:[%s1910_s15 + $0x228] sm:$0xff] }
  0xc5   : > { %1266 = vmatpush1.bf16.msra.mxu1 %v1265_v8  ;;  %1172 = vmatprep.subr.bf16.mxu0 %v1171_v9  ;;  %v484_v8 = vld [vmem:[%s1910_s15 + $0x210] sm:$0xff]  ;;  %v726_v9 = vld [vmem:[%s1918_s27 + $0x200] sm:$0xff]  ;;  %v1287_v10 = vpack.c.bf16 %v729_v3, %v727_v2  ;;  %v731_v14 = vld [vmem:[%s1918_s27 + $0x228] sm:$0xff] }
  0xc6   : > { %1268 = vmatprep.subr.bf16.mxu1 %v1267_v13  ;;  %v489_v13 = vld [vmem:[%s1910_s15 + $0x238] sm:$0xff]  ;;  %v408_v16 = vld [vmem:[#allocation4] sm:$0xff]  ;;  %v1193_v17 = vpack.c.bf16 %v484_v8, %v482_v7  ;;  %v413_v18 = vld [vmem:[#allocation7] sm:$0xff]  ;;  %v1289_v19 = vpack.c.bf16 %v728_v11, %v726_v9 }
  0xc7   : > { %v733_v15 = vld [vmem:[%s1918_s27 + $0x238] sm:$0xff]  ;;  %v730_v23 = vld [vmem:[%s1918_s27 + $0x220] sm:$0xff]  ;;  %v732_v25 = vld [vmem:[%s1918_s27 + $0x230] sm:$0xff] }
  0xc8   : > { %1174 = vmatpush1.bf16.msra.mxu0 %v1173_v20  ;;  %v1195_v20 = vpack.c.bf16 %v489_v13, %v487_v12  ;;  %v1291_v24 = vpack.c.bf16 %v733_v15, %v731_v14  ;;  %v493_v27 = vld [vmem:[%s1910_s15 + $0x258] sm:$0xff]  ;;  %v735_v28 = vld [vmem:[%s1918_s27 + $0x248] sm:$0xff]  ;;  %v1293_v31 = vpack.c.bf16 %v732_v25, %v730_v23  ;;  %v734_v35 = vld [vmem:[%s1918_s27 + $0x240] sm:$0xff] }
  0xc9   : > { %1270 = vmatpush1.bf16.msra.mxu1 %v1269_v21  ;;  %1176 = vmatprep.subr.bf16.mxu0 %v1175_v22  ;;  %v486_v21 = vld [vmem:[%s1910_s15 + $0x220] sm:$0xff]  ;;  %v488_v22 = vld [vmem:[%s1910_s15 + $0x230] sm:$0xff]  ;;  %v737_v29 = vld [vmem:[%s1918_s27 + $0x258] sm:$0xff] }
  0xca   : > { %1272 = vmatprep.subr.bf16.mxu1 %v1271_v26  ;;  %v491_v26 = vld [vmem:[%s1910_s15 + $0x248] sm:$0xff]  ;;  %v1197_v30 = vpack.c.bf16 %v488_v22, %v486_v21  ;;  %v1295_v36 = vpack.c.bf16 %v737_v29, %v735_v28  ;;  %v736_v37 = vld [vmem:[%s1918_s27 + $0x250] sm:$0xff]  ;;  %v497_v39 = vld [vmem:[%s1910_s15 + $0x278] sm:$0xff] }
  0xcb   : > { %v739_v41 = vld [vmem:[%s1918_s27 + $0x268] sm:$0xff]  ;;  %v741_v42 = vld [vmem:[%s1918_s27 + $0x278] sm:$0xff]  ;;  %v496_v47 = vld [vmem:[%s1910_s15 + $0x270] sm:$0xff] }
  0xcc   : > { %1178 = vmatpush1.bf16.msra.mxu0 %v1177_v32  ;;  %v1199_v32 = vpack.c.bf16 %v493_v27, %v491_v26  ;;  %v738_v48 = vld [vmem:[%s1918_s27 + $0x260] sm:$0xff]  ;;  %v1299_v49 = vpack.c.bf16 %v741_v42, %v739_v41  ;;  %v499_v51 = vld [vmem:[%s1910_s15 + $0x288] sm:$0xff]  ;;  %v501_v52 = vld [vmem:[%s1910_s15 + $0x298] sm:$0xff] }
  0xcd   : > { %1274 = vmatpush1.bf16.msra.mxu1 %v1273_v33  ;;  %1180 = vmatprep.subr.bf16.mxu0 %v1179_v34  ;;  %v490_v33 = vld [vmem:[%s1910_s15 + $0x240] sm:$0xff]  ;;  %v492_v34 = vld [vmem:[%s1910_s15 + $0x250] sm:$0xff]  ;;  %v743_v53 = vld [vmem:[%s1918_s27 + $0x288] sm:$0xff] }
  0xce   : > { %1276 = vmatprep.subr.bf16.mxu1 %v1275_v38  ;;  %v495_v38 = vld [vmem:[%s1910_s15 + $0x268] sm:$0xff]  ;;  %v1201_v43 = vpack.c.bf16 %v492_v34, %v490_v33  ;;  %v745_v54 = vld [vmem:[%s1918_s27 + $0x298] sm:$0xff]  ;;  %v500_v59 = vld [vmem:[%s1910_s15 + $0x290] sm:$0xff] }
  0xcf   : > { %v742_v60 = vld [vmem:[%s1918_s27 + $0x280] sm:$0xff]  ;;  %v1303_v61 = vpack.c.bf16 %v745_v54, %v743_v53  ;;  %v503_v63 = vld [vmem:[%s1910_s15 + $0x2a8] sm:$0xff]  ;;  %v505_v0 = vld [vmem:[%s1910_s15 + $0x2b8] sm:$0xff] }
  0xd0   : > { %1182 = vmatpush1.bf16.msra.mxu0 %v1181_v44  ;;  %v1297_v44 = vpack.c.bf16 %v736_v37, %v734_v35  ;;  %v747_v1 = vld [vmem:[%s1918_s27 + $0x2a8] sm:$0xff]  ;;  %v749_v2 = vld [vmem:[%s1918_s27 + $0x2b8] sm:$0xff]  ;;  %v504_v7 = vld [vmem:[%s1910_s15 + $0x2b0] sm:$0xff] }
  0xd1   : > { %1278 = vmatpush1.bf16.msra.mxu1 %v1277_v45  ;;  %1184 = vmatprep.subr.bf16.mxu0 %v1183_v46  ;;  %v1203_v45 = vpack.c.bf16 %v497_v39, %v495_v38  ;;  %v494_v46 = vld [vmem:[%s1910_s15 + $0x260] sm:$0xff]  ;;  %v1307_v9 = vpack.c.bf16 %v749_v2, %v747_v1  ;;  %v507_v11 = vld [vmem:[%s1910_s15 + $0x2c8] sm:$0xff]  ;;  %v509_v12 = vld [vmem:[%s1910_s15 + $0x2d8] sm:$0xff]  ;;  %v913_v39 = vlaneseq }
  0xd2   : > { %1280 = vmatprep.subr.bf16.mxu1 %v1279_v50  ;;  %v740_v50 = vld [vmem:[%s1918_s27 + $0x270] sm:$0xff]  ;;  %v1205_v55 = vpack.c.bf16 %v496_v47, %v494_v46  ;;  %v746_v8 = vld [vmem:[%s1918_s27 + $0x2a0] sm:$0xff]  ;;  %v751_v13 = vld [vmem:[%s1918_s27 + $0x2c8] sm:$0xff] }
  0xd3   : > { %v753_v14 = vld [vmem:[%s1918_s27 + $0x2d8] sm:$0xff]  ;;  %v752_v22 = vld [vmem:[%s1918_s27 + $0x2d0] sm:$0xff]  ;;  %v511_v23 = vld [vmem:[%s1910_s15 + $0x2e8] sm:$0xff] }
  0xd4   : > { %1186 = vmatpush1.bf16.msra.mxu0 %v1185_v56  ;;  %v1301_v56 = vpack.c.bf16 %v740_v50, %v738_v48  ;;  %v1311_v21 = vpack.c.bf16 %v753_v14, %v751_v13  ;;  %v755_v25 = vld [vmem:[%s1918_s27 + $0x2e8] sm:$0xff]  ;;  %v757_v26 = vld [vmem:[%s1918_s27 + $0x2f8] sm:$0xff]  ;;  %v754_v33 = vld [vmem:[%s1918_s27 + $0x2e0] sm:$0xff] }
  0xd5   : > { %1282 = vmatpush1.bf16.msra.mxu1 %v1281_v57  ;;  %1188 = vmatprep.subr.bf16.mxu0 %v1187_v58  ;;  %v1207_v57 = vpack.c.bf16 %v501_v52, %v499_v51  ;;  %v498_v58 = vld [vmem:[%s1910_s15 + $0x280] sm:$0xff]  ;;  %v756_v34 = vld [vmem:[%s1918_s27 + $0x2f0] sm:$0xff]  ;;  %v415_v38 = vld [vmem:[#allocation7 + $0x10] sm:$0xff] }
  0xd6   : > { %1284 = vmatprep.subr.bf16.mxu1 %v1283_v62  ;;  %v744_v62 = vld [vmem:[%s1918_s27 + $0x290] sm:$0xff]  ;;  %v1209_v3 = vpack.c.bf16 %v500_v59, %v498_v58  ;;  %v410_v37 = vld [vmem:[#allocation4 + $0x10] sm:$0xff] }
  0xd7   : > { %v909_v42 = vld [vmem:[%s392_s6] sm:$0x3] }
  0xd8   : > { %1190 = vmatpush1.bf16.msra.mxu0 %v1189_v4  ;;  %v1305_v4 = vpack.c.bf16 %v744_v62, %v742_v60 }
  0xd9   : > { %1286 = vmatpush1.bf16.msra.mxu1 %v1285_v5  ;;  %1192 = vmatprep.subr.bf16.mxu0 %v1191_v6  ;;  %v1211_v5 = vpack.c.bf16 %v505_v0, %v503_v63  ;;  %v502_v6 = vld [vmem:[%s1910_s15 + $0x2a0] sm:$0xff] }
  0xda   : > { %1288 = vmatprep.subr.bf16.mxu1 %v1287_v10  ;;  %v748_v10 = vld [vmem:[%s1918_s27 + $0x2b0] sm:$0xff]  ;;  %v1213_v15 = vpack.c.bf16 %v504_v7, %v502_v6 }
  0xdb   : > { %579 = vmatmul.mubr.f32.vlgmr.msra.gmra.mrb[0].mxu0 %v408_v16  ;;  %v1309_v16 = vpack.c.bf16 %v748_v10, %v746_v8 }
  0xdc   : > { %1194 = vmatpush1.bf16.msra.mxu0 %v1193_v17  ;;  %823 = vmatmul.mubr.f32.vlgmr.msra.gmra.mrb[0].mxu1 %v413_v18  ;;  %v1215_v17 = vpack.c.bf16 %v509_v12, %v507_v11  ;;  %v506_v18 = vld [vmem:[%s1910_s15 + $0x2c0] sm:$0xff] }
  0xdd   : > { %1290 = vmatpush1.bf16.msra.mxu1 %v1289_v19  ;;  %1196 = vmatprep.subr.bf16.mxu0 %v1195_v20  ;;  %v508_v19 = vld [vmem:[%s1910_s15 + $0x2d0] sm:$0xff]  ;;  %v750_v20 = vld [vmem:[%s1918_s27 + $0x2c0] sm:$0xff] }
  0xde   : > { %1292 = vmatprep.subr.bf16.mxu1 %v1291_v24  ;;  %649 = vmatprep.mubr.f32.mxu0 %v1633_v40  ;;  %v513_v24 = vld [vmem:[%s1910_s15 + $0x2f8] sm:$0xff]  ;;  %v1217_v27 = vpack.c.bf16 %v508_v19, %v506_v18  ;;  %v1313_v28 = vpack.c.bf16 %v752_v22, %v750_v20 }
  0xdf   : > { %893 = vmatprep.mubr.f32.mxu1 %v1633_v40  ;;  %v1219_v29 = vpack.c.bf16 %v513_v24, %v511_v23  ;;  %v914_v40 = vshrl.u32 %v913_v39, 7 }
  0xe0   : > { %1198 = vmatpush1.bf16.msra.mxu0 %v1197_v30  ;;  %v510_v30 = vld [vmem:[%s1910_s15 + $0x2e0] sm:$0xff] }
  0xe1   : > { %1294 = vmatpush1.bf16.msra.mxu1 %v1293_v31  ;;  %1200 = vmatprep.subr.bf16.mxu0 %v1199_v32  ;;  %v512_v31 = vld [vmem:[%s1910_s15 + $0x2f0] sm:$0xff]  ;;  %v1315_v32 = vpack.c.bf16 %v757_v26, %v755_v25  ;;  %v915_v41 = vsub.s32 0, %v914_v40 }
  0xe2   : > { %1296 = vmatprep.subr.bf16.mxu1 %v1295_v36  ;;  %v1221_v35 = vpack.c.bf16 %v512_v31, %v510_v30  ;;  %v1317_v36 = vpack.c.bf16 %v756_v34, %v754_v33 }
  0xe4   : > { %1202 = vmatpush1.bf16.msra.mxu0 %v1201_v43  ;;  %v919_v43 = vsub.s32 1, %v914_v40 }
  0xe5   : > { %1298 = vmatpush1.bf16.msra.mxu1 %v1297_v44  ;;  %1204 = vmatprep.subr.bf16.mxu0 %v1203_v45  ;;  %v916_v44 = vrot.slane %v909_v42, %v915_v41  ;;  %v927_v45 = vld [vmem:[%s387_s26] sm:$0x3] }
  0xe6   : > { %1300 = vmatprep.subr.bf16.mxu1 %v1299_v49  ;;  %v920_v46 = vrot.slane %v909_v42, %v919_v43  ;;  %v932_v51 = vrot.slane %v927_v45, %v915_v41  ;;  %v936_v54 = vrot.slane %v927_v45, %v919_v43 }
  0xe8   : > { %1206 = vmatpush1.bf16.msra.mxu0 %v1205_v55 }
  0xe9   : > { %1302 = vmatpush1.bf16.msra.mxu1 %v1301_v56  ;;  %1208 = vmatprep.subr.bf16.mxu0 %v1207_v57 }
  0xea   : > { %1304 = vmatprep.subr.bf16.mxu1 %v1303_v61 }
  0xec   : > { %1210 = vmatpush1.bf16.msra.mxu0 %v1209_v3 }
  0xed   : > { %1306 = vmatpush1.bf16.msra.mxu1 %v1305_v4  ;;  %1212 = vmatprep.subr.bf16.mxu0 %v1211_v5 }
  0xee   : > { %1308 = vmatprep.subr.bf16.mxu1 %v1307_v9 }
  0xf0   : > { %1214 = vmatpush1.bf16.msra.mxu0 %v1213_v15 }
  0xf1   : > { %1310 = vmatpush1.bf16.msra.mxu1 %v1309_v16  ;;  %1216 = vmatprep.subr.bf16.mxu0 %v1215_v17 }
  0xf2   : > { %1312 = vmatprep.subr.bf16.mxu1 %v1311_v21 }
  0xf4   : > { %1218 = vmatpush1.bf16.msra.mxu0 %v1217_v27 }
  0xf5   : > { %1314 = vmatpush1.bf16.msra.mxu1 %v1313_v28  ;;  %1220 = vmatprep.subr.bf16.mxu0 %v1219_v29 }
  0xf6   : > { %1316 = vmatprep.subr.bf16.mxu1 %v1315_v32 }
  0xf8   : > { %1222 = vmatpush1.bf16.msra.mxu0 %v1221_v35 }
  0xf9   : > { %1318 = vmatpush1.bf16.msra.mxu1 %v1317_v36 }
  0xfb   : > { %650 = vmatmul.mubr.f32.vlgmr.msra.gmra.mrb[0].mxu0 %v410_v37 }
  0xfc   : > { %894 = vmatmul.mubr.f32.vlgmr.msra.gmra.mrb[0].mxu1 %v415_v38 }
 0x1ce   : > { %v651_v47 = vpop.f32.mrb[0].mxu0 }
 0x1cf   : > { %v895_v48 = vpop.f32.mrb[0].mxu1  ;;  %v653_v49 = vpop.f32.mrb[1].mxu0 }
 0x1d0   : > { %v923_v50 = vmul.f32 %v916_v44, %v895_v48  ;;  %v897_v52 = vpop.f32.mrb[1].mxu1 }
 0x1d1   : > { %v924_v53 = vmul.f32 %v920_v46, %v897_v52 }
 0x1d2   : > { %v925_v55 = vadd.f32 %v923_v50, %v651_v47 }
 0x1d3   : > { %v926_v56 = vadd.f32 %v924_v53, %v653_v49 }
 0x1d4   : > { %v939_v57 = vadd.f32 %v932_v51, %v925_v55 }
 0x1d5   : > { %v940_v58 = vadd.f32 %v936_v54, %v926_v56 }
 0x1d6   : > { %941 = vst [vmem:[%s379_s16] sm:$0xff] %v939_v57 }
 0x1d7   : > { %942 = vst [vmem:[%s379_s16 + $0x8] sm:$0xff] %v940_v58 }
 0x1d8   : > { %1547 = shalt.err (!%p1544_p0)
}
 0x1d9   : > { %s1548_s2 = scalar_lea.hbm %s2122_s29, 256  ;;  %s1552_s27 = scalar_lea.hbm %s2229_s20, 512 }
 0x1da   : > { %p1549_p2 = scmp.ne.s32.totalorder %s2122_s29, %s1548_s2  ;;  %p1553_p6 = scmp.lt.u32.totalorder %s2122_s29, %s2229_s20 }
 0x1db   : > { %p1554_p9 = scmp.lt.u32.totalorder %s1552_s27, %s1548_s2  ;;  %p1556_p11 = scmp.lt.u32.totalorder %s1548_s2, %s2122_s29 }
 0x1dc   : > { %p1550_p8 = pnand %p1549_p2, %p2230_p4 }
 0x1dd   : > { %p1555_p5 = por %p1554_p9, %p1553_p6 }
 0x1de   : > { %p1551_p13 = pneg %p1550_p8 }
 0x1df   : > { %p1557_p12 = por %p1556_p11, %p1555_p5 }
 0x1e1   : > { %p1558_p10 = pnand %p1557_p12, %p1551_p13 }
 0x1e3   : > { %1561 = shalt.err (!%p1558_p10)
}
 0x1e4   : > { %1338 = dma.vmem_to_hbm [thread:$0]  (%p2230_p4), %s2124_s30, 256, %s2122_s29, %s944_s18  }
 0x1e5 PF: > { %s2231_s11 = sld [smem:[#allocation16_spill]]  ;;  %s2232_s6 = sld [smem:[#allocation19_spill]] }
 0x1e6   : > { %s2233_s21 = sld [smem:[#allocation18_spill]] }
 0x1eb   : > { %s970_s23 = sand.u32 1, %s2231_s11   ;;  %p2234_p1 = scmp.ne.s32.totalorder %s2232_s6, 0 }
 0x1ec   : > { %p2235_p3 = scmp.ge.s32.totalorder %s2233_s21, 2  ;;  %s971_s26 = scalar_lea.sflag [#allocation6], %s970_s23 }
 0x1ee   : > { %p1355_p7 = pnand %p2235_p3, %p2234_p1 }
 0x1f0   : > { %1599 = dma.done.wait (!%p1355_p7), %s971_s26, 256  }
 0x1f1   : > { %1601 = vsyncadd (!%p1355_p7), %s971_s26, 4294967040  ;;  %s21_s26 = sadd.s32 1, %s2233_s21   ;;  %s2236_s9 = sld [smem:[#allocation17_spill]] }
 0x1f2   : > { %p18_p0 = scmp.ge.s32.totalorder %s21_s26, 4   ;;  %s2237_s23 = sld [smem:[#allocation21_spill]] }
 0x1f3   : > { %s2238_s8 = sld [smem:[#allocation20_spill]]  ;;  %s2239_s21 = smov %s1608_s22 }
 0x1f4   : > { %s2241_s24 = smov %s1620_s25  ;;  %20 = sbr.rel (!%p18_p0) target bundleno = 10 (0xa), region = 123 }
 0x1f7   : > { %s2240_s22 = smov %s2236_s9 }
 0x1f9   : > { %s2242_s25 = smov %s2238_s8 }
 0x1fb   :  { %976 = vsyncpa [#allocation5], 1 }
 0x1fc   :  { %978 = vsyncpa [#allocation5 + $0x1], 1 }
 0x1fd   :  { %979 = vsyncpa [#allocation8], 1 }
 0x1fe   :  { %980 = vsyncpa [#allocation6], 1 }
 0x1ff   :  { %982 = vsyncpa [#allocation6 + $0x1], 1 }

</bundles_post_ra>
